<compile_context>
chip_gen: v7x
topology: tpu7x:2x2x1
jax: 0.10.0
libtpu: 0.0.40
codegen_flags: <defaults>
</compile_context>

<pallas_src>
import functools

import jax
import jax.numpy as jnp
from jax.experimental import pallas as pl
from jax.experimental.pallas import tpu as pltpu


def _bpr_max_kernel(diag_ref, x_ref, out_ref, *, n_valid: int, ragged: bool):
    x = x_ref[...].astype(jnp.float32)            # (TM, N)
    d = diag_ref[...].astype(jnp.float32)         # (TM, 1)
    tm = x.shape[0]

    # Row-wise, max-shifted softmax numerator (the only N^2 exp in the kernel).
    m = jnp.max(x, axis=1, keepdims=True)         # (TM, 1)   XLU
    e = jnp.exp(x - m)                            # (TM, N)   EUP
    # diag <= row max, so exp(d - m) <= 1; the clamp only fires on underflow so
    # the sigmoid denominator below is never 0 (the softmax factor is 0 there
    # anyway, so the clamp does not bias the result).
    e_diag = jnp.maximum(jnp.exp(d - m), 1e-30)   # (TM, 1)

    # softmax_ij * sigmoid(d_i - x_ij)
    #   = (e_ij / rowsum_i) * (e_diag_i / (e_diag_i + e_ij))
    #   = e_ij * c_i * rcp(e_diag_i + e_ij),  c_i = e_diag_i / rowsum_i
    inv_rowsum = pl.reciprocal(jnp.sum(e, axis=1, keepdims=True))   # (TM,1) exact
    c = e_diag * inv_rowsum                                         # (TM, 1)
    prod = (e * c) * pl.reciprocal(e_diag + e, approx=True)         # (TM, N)

    row_sums = jnp.sum(prod, axis=1, keepdims=True)                 # (TM, 1)
    if ragged:
        # Only emitted when N % TM != 0: zero the edge-block garbage rows with
        # a cheap (TM, 1) select (no N^2 iota / compare / where).
        i = pl.program_id(0)
        row_ids = i * tm + jax.lax.broadcasted_iota(jnp.int32, (tm, 1), 0)
        row_sums = jnp.where(row_ids < n_valid, row_sums, 0.0)

    tile_sum = jnp.sum(row_sums)
    # Lane-dense (8, 128) partial-sum output block; every entry holds this
    # tile's sum, the epilogue reads one value per grid step.
    out_ref[...] = jnp.broadcast_to(tile_sum, out_ref.shape).astype(jnp.float32)


def _vmem_limit_bytes() -> int:
    """Scoped-VMEM limit derived from the generation's physical VMEM."""
    cap = None
    try:
        cap = getattr(pltpu.get_tpu_info(), "vmem_capacity_bytes", None)
    except Exception:
        cap = None
    if not cap:
        cap = 64 * 1024 * 1024          # conservative: assume v7x-sized VMEM
    # 3/4 of physical, never above 64 MiB: 48 MiB on v7x (64 MiB physical),
    # 64 MiB on v5e/v6e (128 MiB physical; also lifts the 16 MiB v5e default).
    return int(min((cap * 3) // 4, 64 * 1024 * 1024))


def bpr_max(logit: jax.Array, *, block_rows: int | None = None) -> jax.Array:
    """BPR-max loss for a square (N, N) logit matrix (f32 or bf16 input)."""
    assert logit.ndim == 2 and logit.shape[0] == logit.shape[1], logit.shape
    n = logit.shape[0]

    vmem_limit = _vmem_limit_bytes()
    # Budget the *live* per-step footprint at half the scoped limit:
    #   2 double-buffered input tiles (input dtype) + ~4 (TM, N) f32 temps.
    budget = vmem_limit // 2
    in_bytes = logit.dtype.itemsize
    per_row_bytes = n * (2 * in_bytes + 4 * 4)

    if 8 * per_row_bytes > budget:
        # TODO(synk): column-tiled online-softmax path for very wide N.
        raise ValueError(
            f"N={n} too wide for single-pass row tiling "
            f"(8-row tile needs {8 * per_row_bytes} B, budget {budget} B)")

    if block_rows is None:
        block_rows = budget // per_row_bytes
    block_rows = max(8, min(1024, block_rows))
    block_rows = (block_rows // 8) * 8
    # v7x megacore: keep >= 2 balanced grid steps whenever N allows it so the
    # "parallel" axis can shard across both TensorCores (no-op on v5e/v6e).
    half_n = ((-(-n // 2) + 7) // 8) * 8
    block_rows = min(block_rows, max(8, half_n))
    block_rows = min(block_rows, ((n + 7) // 8) * 8)   # don't exceed padded N

    grid_steps = pl.cdiv(n, block_rows)
    ragged = (n % block_rows) != 0
    diag = jnp.diagonal(logit).reshape(n, 1)           # tiny (N, 1) side input

    kernel = functools.partial(_bpr_max_kernel, n_valid=n, ragged=ragged)
    partial = pl.pallas_call(
        kernel,
        out_shape=jax.ShapeDtypeStruct((grid_steps * 8, 128), jnp.float32),
        grid=(grid_steps,),
        in_specs=[
            pl.BlockSpec((block_rows, 1), lambda i: (i, 0)),   # diagonal rows
            pl.BlockSpec((block_rows, n), lambda i: (i, 0)),   # logit row block
        ],
        out_specs=pl.BlockSpec((8, 128), lambda i: (i, 0)),
        compiler_params=pltpu.CompilerParams(
            dimension_semantics=("parallel",),       # megacore-shardable on v7x
            vmem_limit_bytes=vmem_limit,
        ),
    )(diag, logit)

    total = partial[::8, 0].sum()                    # one scalar per grid step
    return -jnp.log(total / (n * n))


def _reference(logit: jax.Array) -> jax.Array:
    x = logit.astype(jnp.float32)
    sm = jax.nn.softmax(x, axis=1)
    diff = jnp.diag(x)[:, None] - x
    return -jnp.log(jnp.mean(sm * jax.nn.sigmoid(diff)))


if __name__ == "__main__":
    key = jax.random.PRNGKey(0)

    # Small square logit matrix, single grid step, no ragged edge.
    N = 8
    logit = jax.random.normal(key, (N, N), dtype=jnp.float32)
    loss = bpr_max(logit)
    jax.block_until_ready(loss)
    ref = _reference(logit)
    # approx EUP reciprocal introduces a small (~1e-4 .. 1e-3) absolute error.
    assert jnp.isfinite(loss), loss
    assert jnp.allclose(loss, ref, atol=5e-3, rtol=5e-3), (loss, ref)

    # Non-divisible N with a forced small row block: exercises the multi-step
    # ("parallel") grid and the ragged edge-block row masking.
    N2 = 20
    logit2 = jax.random.normal(jax.random.PRNGKey(1), (N2, N2), dtype=jnp.float32)
    loss2 = bpr_max(logit2, block_rows=8)
    jax.block_until_ready(loss2)
    ref2 = _reference(logit2)
    assert jnp.isfinite(loss2), loss2
    assert jnp.allclose(loss2, ref2, atol=5e-3, rtol=5e-3), (loss2, ref2)

    # bf16 input path (dtype-aware tiling, in-kernel f32 upcast), default
    # block_rows -> ceil(N/2)-capped 2-step grid with a ragged edge block.
    N3 = 24
    logit3 = jax.random.normal(jax.random.PRNGKey(2), (N3, N3)).astype(jnp.bfloat16)
    loss3 = bpr_max(logit3)
    jax.block_until_ready(loss3)
    ref3 = _reference(logit3)
    assert jnp.isfinite(loss3), loss3
    assert jnp.allclose(loss3, ref3, atol=5e-3, rtol=5e-3), (loss3, ref3)

    print("KERNEL_OK")
</pallas_src>

<mosaic_0001>
module attributes {stable_mosaic.version = 11 : i64} {
  func.func @_bpr_max_kernel(%arg0: i32, %arg1: memref<8x1xf32, #tpu.memory_space<vmem>>, %arg2: memref<8x8xf32, #tpu.memory_space<vmem>>, %arg3: memref<8x128xf32, #tpu.memory_space<vmem>>) attributes {dimension_semantics = [#tpu.dimension_semantics<parallel>], iteration_bounds = array<i64: 1>, scalar_prefetch = 0 : i64, scratch_operands = 0 : i64, tpu.core_type = #tpu.core_type<tc>, window_params = [{transform_indices = @transform_0, window_bounds = array<i64: 8, 1>}, {transform_indices = @transform_1, window_bounds = array<i64: 8, 8>}, {transform_indices = @transform_2, window_bounds = array<i64: 8, 128>}]} {
    %c0 = arith.constant 0 : index
    %c0_0 = arith.constant 0 : index
    %0 = vector.load %arg2[%c0, %c0_0] : memref<8x8xf32, #tpu.memory_space<vmem>>, vector<8x8xf32>
    %c0_1 = arith.constant 0 : index
    %c0_2 = arith.constant 0 : index
    %1 = vector.load %arg1[%c0_1, %c0_2] : memref<8x1xf32, #tpu.memory_space<vmem>>, vector<8x1xf32>
    %cst = arith.constant dense<0xFF800000> : vector<8xf32>
    %2 = vector.multi_reduction <maximumf>, %0, %cst [1] : vector<8x8xf32> to vector<8xf32>
    %3 = vector.shape_cast %2 : vector<8xf32> to vector<8x1xf32>
    %4 = vector.broadcast %3 : vector<8x1xf32> to vector<8x8xf32>
    %5 = arith.subf %0, %4 : vector<8x8xf32>
    %6 = math.exp %5 : vector<8x8xf32>
    %7 = arith.subf %1, %3 : vector<8x1xf32>
    %8 = math.exp %7 : vector<8x1xf32>
    %cst_3 = arith.constant 1.000000e-30 : f32
    %9 = vector.broadcast %cst_3 : f32 to vector<8x1xf32>
    %10 = arith.maximumf %8, %9 : vector<8x1xf32>
    %cst_4 = arith.constant dense<0.000000e+00> : vector<8xf32>
    %11 = vector.multi_reduction <add>, %6, %cst_4 [1] : vector<8x8xf32> to vector<8xf32>
    %12 = vector.shape_cast %11 : vector<8xf32> to vector<8x1xf32>
    %13 = tpu.reciprocal %12 : vector<8x1xf32> -> vector<8x1xf32>
    %14 = arith.mulf %10, %13 : vector<8x1xf32>
    %15 = vector.broadcast %14 : vector<8x1xf32> to vector<8x8xf32>
    %16 = arith.mulf %6, %15 : vector<8x8xf32>
    %17 = vector.broadcast %10 : vector<8x1xf32> to vector<8x8xf32>
    %18 = arith.addf %17, %6 : vector<8x8xf32>
    %19 = tpu.reciprocal %18 {approx = true} : vector<8x8xf32> -> vector<8x8xf32>
    %20 = arith.mulf %16, %19 : vector<8x8xf32>
    %cst_5 = arith.constant dense<0.000000e+00> : vector<8xf32>
    %21 = vector.multi_reduction <add>, %20, %cst_5 [1] : vector<8x8xf32> to vector<8xf32>
    %22 = vector.shape_cast %21 : vector<8xf32> to vector<8x1xf32>
    %23 = vector.shape_cast %22 : vector<8x1xf32> to vector<1x8x1xf32>
    %cst_6 = arith.constant dense<0.000000e+00> : vector<1xf32>
    %24 = vector.multi_reduction <add>, %23, %cst_6 [1, 2] : vector<1x8x1xf32> to vector<1xf32>
    %25 = vector.shape_cast %24 : vector<1xf32> to vector<1x1x1xf32>
    %26 = vector.extract %25[0, 0, 0] : f32 from vector<1x1x1xf32>
    %27 = vector.broadcast %26 : f32 to vector<8x128xf32>
    %c0_7 = arith.constant 0 : index
    %c0_8 = arith.constant 0 : index
    %28 = vector.load %arg3[%c0_7, %c0_8] : memref<8x128xf32, #tpu.memory_space<vmem>>, vector<8x128xf32>
    tpu.vector_store %arg3[%c0_7, %c0_8], %27 {strides = array<i32>} : memref<8x128xf32, #tpu.memory_space<vmem>>, vector<8x128xf32>,
    return
  }
  func.func @transform_0(%arg0: i32) -> (i32, i32) {
    %c0_i32 = arith.constant 0 : i32
    %c0_i32_0 = arith.constant 0 : i32
    return %arg0, %c0_i32 : i32, i32
  }
  func.func @transform_1(%arg0: i32) -> (i32, i32) {
    %c0_i32 = arith.constant 0 : i32
    %c0_i32_0 = arith.constant 0 : i32
    return %arg0, %c0_i32 : i32, i32
  }
  func.func @transform_2(%arg0: i32) -> (i32, i32) {
    %c0_i32 = arith.constant 0 : i32
    %c0_i32_0 = arith.constant 0 : i32
    return %arg0, %c0_i32 : i32, i32
  }
}

</mosaic_0001>

<bundles_post_ra>
// kernel: tpu_custom_call.1
= control target key start
LH: loop header
LB: loop body
LE: loop exit
PB: predicated region body
PF: predicated region fallthrough
CT: control target
= control target key end

     0   :  { %vm14_vm0 = vcmask 64512   ;;  %s150_s0 = inlined_call_operand.vmem [shape: f32[8,1], index: 0, kind: input, shape index: {}]   ;;  %s151_s1 = inlined_call_operand.vmem [shape: f32[8,8], index: 1, kind: input, shape index: {}]   ;;  %s152_s2 = inlined_call_operand.hbm [shape: f32[8,128], index: 2, kind: output, shape index: {}]  }
   0x1   :  { %v12_v0 = vld [vmem:[%s151_s1] sm:$0xff] }
   0x2   :  { %7 = vsyncpa [#allocation3], 0  ;;  %v15_v1 = vsel %vm14_vm0, %v12_v0, -inf  ;;  %v112_v2 = vmov 0   ;;  %v13_v3 = vld [vmem:[%s150_s0] sm:$0xff]  ;;  %vm47_vm1 = vcmask 7168  }
   0x3   :  { %16 = vmax.xlane.f32.xlu0 %v15_v1  ;;  %78 = vset.pattern.permute.xlu1 %v112_v2  ;;  %s113_s0 = smov [#allocation2]  }
   0x4   :  { %79 = vset.pattern.permute.xlu0 %v112_v2  ;;  %s66_s1 = sshll.u32 %s113_s0, 4  ;;  %s67_s1 = int_to_ptr.vmem [resolvable:$true] %s66_s1 }
   0x5   :  { %s88_s14 = scalar_lea.vmem %s67_s1, 128  ;;  %p93_p1 = scmp.lt.s32.totalorder %s67_s1, %s67_s1 }
   0x6   :  { %p89_p0 = scmp.ne.s32.totalorder %s67_s1, %s88_s14  ;;  %p94_p2 = scmp.lt.s32.totalorder %s88_s14, %s88_s14 }
   0x8   :  { %p95_p3 = por %p94_p2, %p93_p1 }
   0xa   :  { %p96_p4 = pnand %p95_p3, %p89_p0 }
  0x90   :  { %v17_v4 = vpop.xlane.xlu0 %16 }
  0x91   :  { %v18_v5 = vsub.f32 %v12_v0, %v17_v4  ;;  %v21_v6 = vsub.f32 %v13_v3, %v17_v4 }
  0x93   :  { %v19_v7 = vmul.f32 1.442695, %v18_v5  ;;  %v22_v8 = vmul.f32 1.442695, %v21_v6 }
  0x95   :  { %80 = vpow2.f32 %v19_v7 }
  0x96   :  { %82 = vpow2.f32 %v22_v8 }
  0x9f   :  { %v81_v9 = vpop.eup %80 }
  0xa0   :  { %v83_v10 = vpop.eup %82  ;;  %v25_v11 = vsel %vm14_vm0, %v81_v9, 0.0 }
  0xa1   :  { %26 = vadd.xlane.f32.xlu0 %v25_v11  ;;  %v24_v12 = vmax.f32 %v83_v10, 1e-30 }
  0xa3   :  { %38 = vperm.xlu1 %78, %v24_v12  }
 0x122   :  { %v39_v16 = vpop.permute.xlu1 %38 }
 0x123   :  { %v41_v17 = vadd.f32 %v81_v9, %v39_v16 }
 0x12e   :  { %v27_v13 = vpop.xlane.xlu0 %26 }
 0x12f   :  { %84 = vrcp.f32 %v27_v13 }
 0x130   :  { %86 = vrcp.f32 %v41_v17 }
 0x139   :  { %v85_v14 = vpop.eup %84 }
 0x13a   :  { %v29_v15 = vmul.f32 %v85_v14, %v24_v12  ;;  %v87_v20 = vpop.eup %86 }
 0x13c   :  { %32 = vperm.xlu1 %78, %v29_v15  }
 0x1bb   :  { %v33_v18 = vpop.permute.xlu1 %32 }
 0x1bc   :  { %v35_v19 = vmul.f32 %v81_v9, %v33_v18 }
 0x1be   :  { %v43_v21 = vmul.f32 %v87_v20, %v35_v19 }
 0x1c0   :  { %v44_v22 = vsel %vm14_vm0, %v43_v21, 0.0 }
 0x1c1   :  { %45 = vadd.xlane.f32.xlu0 %v44_v22 }
 0x24e   :  { %v46_v23 = vpop.xlane.xlu0 %45 }
 0x24f   :  { %v48_v24 = vsel %vm47_vm1, %v46_v23, 0.0 }
 0x250   :  { %49 = vadd.xlane.f32.xlu1 %v48_v24 }
 0x2dd   :  { %v50_v25 = vpop.xlane.xlu1 %49 }
 0x2de   :  { %v51_v26 = vrot.slane %v50_v25, 4 }
 0x2e0   :  { %v52_v27 = vadd.f32 %v51_v26, %v50_v25 }
 0x2e2   :  { %v53_v28 = vrot.slane %v52_v27, 2 }
 0x2e4   :  { %v54_v29 = vadd.f32 %v53_v28, %v52_v27 }
 0x2e6   :  { %v55_v30 = vrot.slane %v54_v29, 1 }
 0x2e8   :  { %v56_v31 = vadd.f32 %v55_v30, %v54_v29 }
 0x2ea   :  { %74 = vpush %v56_v31 }
 0x31b   :  { %s75_s13 = spop %74 }
 0x31c   :  { %v58_v32 = vstv %s75_s13 }
 0x31d   :  { %59 = vst [vmem:[#allocation2] sm:$0xff] %v58_v32 }
 0x31e   :  { %99 = shalt.err (!%p96_p4)
}
 0x31f   :  { %s100_s17 = scalar_lea.hbm %s152_s2, 128 }
 0x320   :  { %p101_p5 = scmp.ne.s32.totalorder %s152_s2, %s100_s17  ;;  %p104_p6 = scmp.lt.u32.totalorder %s100_s17, %s152_s2 }
 0x322   :  { %p106_p7 = pnand %p104_p6, %p101_p5 }
 0x324   :  { %109 = shalt.err (!%p106_p7)
}
 0x325   :  { %69 = dma.vmem_to_hbm [thread:$0]  %s67_s1, 128, %s152_s2, [#allocation3]  }
 0x326   :  { %110 = dma.done.wait [#allocation3], 128  }
 0x327   :  { %111 = vsyncadd [#allocation3], 4294967168 }
 0x328   :  { %73 = vsyncpa [#allocation3], 1 }

</bundles_post_ra>
